<compile_context>
chip_gen: v6e
topology: v6e:2x2x1
jax: 0.10.0
libtpu: 0.0.40
codegen_flags: <defaults>
</compile_context>

<pallas_src>
import functools

import jax
import jax.numpy as jnp
from jax import lax
from jax.experimental import pallas as pl
from jax.experimental.pallas import tpu as pltpu


# ----------------------- roll-convention probe (cached) ----------------------

@functools.cache
def _pltpu_roll_matches_jnp():
    """True iff pltpu.roll(x, s, axis)[..., i] == x[..., (i - s) % n] (jnp.roll).

    Must be called outside jit (it runs a tiny probe kernel once per process).
    """
    def k(x_ref, o_ref):
        o_ref[...] = pltpu.roll(x_ref[...], 1, axis=1)

    x = lax.broadcasted_iota(jnp.float32, (8, 128), 1)
    out = pl.pallas_call(
        k, out_shape=jax.ShapeDtypeStruct((8, 128), jnp.float32))(x)
    return bool(out[0, 0] == 127.0)


# ----------------------- host-side pool boundary masks ------------------------

def _build_pool_masks(D, H, W, DHWp, roll_is_jnp):
    """Per-shift boundary masks for the separable 3x3x3 (pad=1) max pool.

    Returns (axis_groups, masks):
      axis_groups: 3 lists (W, H, D order) of (shift, mask_index) pairs
      masks      : list of (1, 1, 1, DHWp) f32 arrays (1.0 where the circularly
                   rolled source really is the in-volume neighbor, else 0.0)
    Padded lanes (index >= D*H*W) get sentinel coordinates so they never match.
    """
    DHW = D * H * W
    idx = jnp.arange(DHWp, dtype=jnp.int32)
    real = idx < DHW
    sentinel = jnp.int32(-10_000)
    w_pos = jnp.where(real, idx % W, sentinel)
    h_pos = jnp.where(real, (idx // W) % H, sentinel)
    d_pos = jnp.where(real, idx // (W * H), sentinel)
    coords = (d_pos, h_pos, w_pos)

    masks = []
    axis_groups = []
    for step, pooled in ((1, 2), (W, 1), (W * H, 0)):   # W, H, D axes
        group = []
        seen = set()
        for s in (step % DHWp, (-step) % DHWp):          # both roll directions
            if s == 0 or s in seen:
                continue
            seen.add(s)
            # flat source index that lands on destination i after roll by s
            src = (idx - s) % DHWp if roll_is_jnp else (idx + s) % DHWp
            ok = jnp.abs(coords[pooled][src] - coords[pooled]) == 1
            for j in range(3):
                if j != pooled:
                    ok = ok & (coords[j][src] == coords[j])
            group.append((s, len(masks)))
            masks.append(ok.astype(jnp.float32).reshape(1, 1, 1, DHWp))
        axis_groups.append(group)
    return axis_groups, masks


# ----------------------------- Pallas kernel ----------------------------------

def _make_subspace_kernel(axis_groups, n_masks):
    LANE = 3  # last axis of the (bt, 1, G, DHWp) tile

    def kernel(x_ref, a_ref, b_ref, wp_ref, bp_ref, *rest):
        # x_ref : (bt, 1, G, DHWp)  input sub-feature tile (zero-padded lanes)
        # a_ref : (1, 1, G, 1)      fused depthwise-conv * BN scale
        # b_ref : (1, 1, G, 1)      fused depthwise-conv / BN bias
        # wp_ref: (1, 1, G, 1)      fused pointwise-conv weight (BN-scaled)
        # bp_ref: (1, 1, 1, 1)      fused pointwise-conv / BN bias
        # rest  : n_masks pool-boundary masks (1,1,1,DHWp), valid mask, o_ref
        mask_refs = rest[:n_masks]
        valid_ref = rest[n_masks]
        o_ref = rest[n_masks + 1]

        # Depthwise 1x1x1 conv + BatchNorm (inference) + ReLU, folded affine.
        # x is NOT kept as a long-lived f32 temp; it is re-read at the end.
        y = jnp.maximum(x_ref[...].astype(jnp.float32) * a_ref[...] + b_ref[...],
                        0.0)                                   # >= 0 (needed below)

        # 3x3x3 max pool (stride 1, pad 1), separable along W/H/D.
        # One XLU roll + one precomputed boundary mask per direction; masking
        # to 0 is exact because every pooled value is >= 0 after the ReLU.
        m = y
        for group in axis_groups:
            v = m                                  # input to this axis' 3-window
            for s, mi in group:
                m = jnp.maximum(m, pltpu.roll(v, s, axis=LANE) * mask_refs[mi][...])

        # Pointwise conv (G -> 1) + BatchNorm + ReLU, folded: weighted sublane sum.
        # (Kept on the VPU/XLU path: a single cross-sublane reduce; the MXU
        #  variant was not needed once the coordinate rolls were removed.)
        z = jnp.maximum(jnp.sum(m * wp_ref[...], axis=2, keepdims=True)
                        + bp_ref[...], 0.0)                    # (bt, 1, 1, DHWp)

        # Softmax over the flattened (real) D*H*W lanes; padded lanes excluded.
        valid = valid_ref[...]
        z = z * valid                               # exact: z >= 0, pad lanes -> 0
        zmax = jnp.max(z, axis=LANE, keepdims=True)
        e = jnp.exp(z - zmax) * valid
        denom = jnp.sum(e, axis=LANE, keepdims=True)            # >= 1
        attn = e / denom                                        # (bt, 1, 1, DHWp)

        # out = attn * x + x, attention broadcast over the G channels.
        o_ref[...] = (x_ref[...].astype(jnp.float32) * (attn + 1.0)).astype(o_ref.dtype)

    return kernel


# ------------------------------ VMEM sizing -----------------------------------

def _usable_vmem_bytes():
    """Per-generation VMEM budget: ~75% of physical (v5e/v6e 128 MiB, v7x 64 MiB)."""
    try:
        cap = int(pltpu.get_tpu_info().vmem_capacity_bytes)
    except Exception:
        cap = 64 * 2**20          # conservative fallback (v7x-sized)
    return max(16 * 2**20, (cap * 3) // 4)


def _pick_batch_tile(Bsz, S, G, DHWp, itemsize, usable_vmem):
    # Per batch element: 2x double-buffered (in + out) tiles in x.dtype
    # plus ~4 full-tile f32 temporaries (y, m, rolled temp, slack).
    per_batch = G * DHWp * (4 * itemsize + 4 * 4)
    bt = max(1, min(Bsz, usable_vmem // max(1, per_batch)))
    while Bsz % bt:               # largest divisor of Bsz not exceeding the budget
        bt -= 1
    # Keep the grid >= 2 steps when possible so both v7x TensorCores get work.
    if (Bsz // bt) * S < 2 and bt > 1:
        bt2 = bt - 1
        while bt2 > 1 and Bsz % bt2:
            bt2 -= 1
        bt = bt2
    return bt


# --------------------------------- wrapper -------------------------------------

def ulsam3d_pallas(x, A, Bv, Wp, Bp, *, batch_tile=None):
    """x: (B, C, D, H, W); A, Bv, Wp: (S, G); Bp: (S,)  with C = S*G."""
    Bsz, C, D, H, W = x.shape
    S, G = A.shape
    assert C == S * G
    DHW = D * H * W
    DHWp = max(128, ((DHW + 127) // 128) * 128)    # lane-dense stores
    pad = DHWp - DHW

    # Lane-dense relayout: channels -> (S, G) on sublanes, volume on lanes.
    xr = x.reshape(Bsz, S, G, DHW)
    if pad:
        xr = jnp.pad(xr, ((0, 0), (0, 0), (0, 0), (0, pad)))

    A4 = A.reshape(S, 1, G, 1).astype(jnp.float32)
    B4 = Bv.reshape(S, 1, G, 1).astype(jnp.float32)
    W4 = Wp.reshape(S, 1, G, 1).astype(jnp.float32)
    P4 = Bp.reshape(S, 1, 1, 1).astype(jnp.float32)

    roll_is_jnp = _pltpu_roll_matches_jnp()
    axis_groups, masks = _build_pool_masks(D, H, W, DHWp, roll_is_jnp)
    n_masks = len(masks)
    valid = (jnp.arange(DHWp) < DHW).astype(jnp.float32).reshape(1, 1, 1, DHWp)

    usable = _usable_vmem_bytes()
    bt = (batch_tile if batch_tile is not None
          else _pick_batch_tile(Bsz, S, G, DHWp, x.dtype.itemsize, usable))
    assert Bsz % bt == 0
    nbt = Bsz // bt

    feat_spec = pl.BlockSpec((bt, 1, G, DHWp), lambda b, s: (b, s, 0, 0))
    chan_spec = pl.BlockSpec((1, 1, G, 1), lambda b, s: (s, 0, 0, 0))
    scal_spec = pl.BlockSpec((1, 1, 1, 1), lambda b, s: (s, 0, 0, 0))
    lane_spec = pl.BlockSpec((1, 1, 1, DHWp), lambda b, s: (0, 0, 0, 0))

    out = pl.pallas_call(
        _make_subspace_kernel(axis_groups, n_masks),
        out_shape=jax.ShapeDtypeStruct((Bsz, S, G, DHWp), x.dtype),
        grid_spec=pltpu.PrefetchScalarGridSpec(
            num_scalar_prefetch=0,
            grid=(nbt, S),        # batch outer, split inner (contiguous reads)
            in_specs=[feat_spec, chan_spec, chan_spec, chan_spec, scal_spec]
                     + [lane_spec] * n_masks + [lane_spec],
            out_specs=feat_spec,
        ),
        compiler_params=pltpu.CompilerParams(
            dimension_semantics=("parallel", "parallel"),
            vmem_limit_bytes=int(usable)),
    )(xr, A4, B4, W4, P4, *masks, valid)

    if pad:
        out = out[..., :DHW]
    return out.reshape(Bsz, C, D, H, W)


# ------------------------ parameter init / fusion ------------------------------

def init_fused_params(key, nin, num_splits, eps=1e-5):
    """Deterministically initialize SubSpace3D params for each split and fold
    conv + inference BatchNorm into affine coefficients."""
    S = num_splits
    G = nin // num_splits
    ks = jax.random.split(key, 12)

    # depthwise 1x1x1 conv (groups=G): per-channel scale + bias
    w_dws = 0.5 * jax.random.normal(ks[0], (S, G))
    b_dws = 0.1 * jax.random.normal(ks[1], (S, G))
    # bn_dws (per-channel)
    g_dws = 1.0 + 0.1 * jax.random.normal(ks[2], (S, G))
    beta_dws = 0.1 * jax.random.normal(ks[3], (S, G))
    mean_dws = 0.1 * jax.random.normal(ks[4], (S, G))
    var_dws = 0.5 + 0.5 * jnp.abs(jax.random.normal(ks[5], (S, G)))
    # pointwise conv (G -> 1)
    w_pt = 0.5 * jax.random.normal(ks[6], (S, G))
    b_pt = 0.1 * jax.random.normal(ks[7], (S,))
    # bn_point (single channel)
    g_pt = 1.0 + 0.1 * jax.random.normal(ks[8], (S,))
    beta_pt = 0.1 * jax.random.normal(ks[9], (S,))
    mean_pt = 0.1 * jax.random.normal(ks[10], (S,))
    var_pt = 0.5 + 0.5 * jnp.abs(jax.random.normal(ks[11], (S,)))

    s_dws = g_dws / jnp.sqrt(var_dws + eps)
    A = w_dws * s_dws
    Bv = (b_dws - mean_dws) * s_dws + beta_dws

    s_pt = g_pt / jnp.sqrt(var_pt + eps)
    Wp = w_pt * s_pt[:, None]
    Bp = (b_pt - mean_pt) * s_pt + beta_pt
    return A, Bv, Wp, Bp


# --------------------------------- reference -----------------------------------

def ulsam3d_reference(x, A, Bv, Wp, Bp):
    Bsz, C, D, H, W = x.shape
    S, G = A.shape
    outs = []
    for s in range(S):
        xs = x[:, s * G:(s + 1) * G]
        a = A[s].reshape(1, G, 1, 1, 1)
        b = Bv[s].reshape(1, G, 1, 1, 1)
        y = jnp.maximum(xs * a + b, 0.0)
        m = lax.reduce_window(
            y, -jnp.inf, lax.max,
            window_dimensions=(1, 1, 3, 3, 3),
            window_strides=(1, 1, 1, 1, 1),
            padding=((0, 0), (0, 0), (1, 1), (1, 1), (1, 1)))
        z = jnp.sum(m * Wp[s].reshape(1, G, 1, 1, 1), axis=1, keepdims=True) + Bp[s]
        z = jnp.maximum(z, 0.0)
        attn = jax.nn.softmax(z.reshape(Bsz, 1, -1), axis=2).reshape(Bsz, 1, D, H, W)
        outs.append(xs * (attn + 1.0))
    return jnp.concatenate(outs, axis=1)


# ----------------------------------- main ---------------------------------------

if __name__ == "__main__":
    key = jax.random.PRNGKey(0)

    # Case 1: lane-dense shape (D*H*W = 512, a multiple of 128).
    B, nin, D, H, W, S = 2, 16, 8, 8, 8, 2
    kx, kp, key = jax.random.split(key, 3)
    x = jax.random.normal(kx, (B, nin, D, H, W), dtype=jnp.float32)
    A, Bv, Wp, Bp = init_fused_params(kp, nin, S)

    out = jax.block_until_ready(ulsam3d_pallas(x, A, Bv, Wp, Bp))
    ref = jax.block_until_ready(ulsam3d_reference(x, A, Bv, Wp, Bp))
    assert out.shape == ref.shape == (B, nin, D, H, W)
    assert jnp.allclose(out, ref, rtol=1e-4, atol=1e-4), (
        float(jnp.max(jnp.abs(out - ref))))

    # Case 2: D*H*W = 210 (not a multiple of 128) exercises the lane-padding path.
    B2, nin2, D2, H2, W2, S2 = 1, 8, 5, 6, 7, 2
    kx2, kp2 = jax.random.split(key)
    x2 = jax.random.normal(kx2, (B2, nin2, D2, H2, W2), dtype=jnp.float32)
    A2, Bv2, Wp2, Bp2 = init_fused_params(kp2, nin2, S2)

    out2 = jax.block_until_ready(ulsam3d_pallas(x2, A2, Bv2, Wp2, Bp2))
    ref2 = jax.block_until_ready(ulsam3d_reference(x2, A2, Bv2, Wp2, Bp2))
    assert out2.shape == ref2.shape == (B2, nin2, D2, H2, W2)
    assert jnp.allclose(out2, ref2, rtol=1e-4, atol=1e-4), (
        float(jnp.max(jnp.abs(out2 - ref2))))

    print("KERNEL_OK")
</pallas_src>

<mosaic_0001>
module attributes {stable_mosaic.version = 11 : i64} {
  func.func @k(%arg0: memref<8x128xf32, #tpu.memory_space<vmem>>, %arg1: memref<8x128xf32, #tpu.memory_space<vmem>>) attributes {dimension_semantics = [], scalar_prefetch = 0 : i64, scratch_operands = 0 : i64, tpu.core_type = #tpu.core_type<tc>} {
    %c0 = arith.constant 0 : index
    %c0_0 = arith.constant 0 : index
    %0 = vector.load %arg0[%c0, %c0_0] : memref<8x128xf32, #tpu.memory_space<vmem>>, vector<8x128xf32>
    %c1_i32 = arith.constant 1 : i32
    %1 = tpu.dynamic_rotate %0 by %c1_i32 dim 1 : vector<8x128xf32>, i32 -> vector<8x128xf32>
    %c0_1 = arith.constant 0 : index
    %c0_2 = arith.constant 0 : index
    %2 = vector.load %arg1[%c0_1, %c0_2] : memref<8x128xf32, #tpu.memory_space<vmem>>, vector<8x128xf32>
    tpu.vector_store %arg1[%c0_1, %c0_2], %1 {strides = array<i32>} : memref<8x128xf32, #tpu.memory_space<vmem>>, vector<8x128xf32>,
    return
  }
}

</mosaic_0001>

<bundles_post_ra>
// kernel: tpu_custom_call.1
= control target key start
LH: loop header
LB: loop body
LE: loop exit
PB: predicated region body
PF: predicated region fallthrough
CT: control target
= control target key end

     0   :  { %6 = vsyncpa [#allocation3], 0  ;;  %s106_s0 = inlined_call_operand.hbm [shape: f32[8,128], index: 0, kind: input, shape index: {}]   ;;  %s107_s1 = inlined_call_operand.hbm [shape: f32[8,128], index: 1, kind: output, shape index: {}]  }
   0x1   :  { %7 = vsyncpa [#allocation4], 0  ;;  %s87_s6 = smov [#allocation2]  }
   0x2   :  { %s14_s7 = sshll.u32 %s87_s6, 4  ;;  %s15_s7 = int_to_ptr.vmem [resolvable:$true] %s14_s7 }
   0x3   :  { %s51_s8 = scalar_lea.vmem %s15_s7, 128  ;;  %p56_p1 = scmp.lt.s32.totalorder %s15_s7, %s15_s7 }
   0x4   :  { %p52_p0 = scmp.ne.s32.totalorder %s15_s7, %s51_s8  ;;  %p57_p2 = scmp.lt.s32.totalorder %s51_s8, %s51_s8 }
   0x6   :  { %p58_p3 = por %p57_p2, %p56_p1 }
   0x8   :  { %p59_p4 = pnand %p58_p3, %p52_p0 }
   0xa   :  { %62 = shalt.err (!%p59_p4)
}
   0xb   :  { %17 = dma.hbm_to_vmem [thread:$0]  %s106_s0, 128, %s15_s7, [#allocation3]  }
   0xc   :  { %83 = dma.done.wait [#allocation3], 128  }
   0xd   :  { %84 = vsyncadd [#allocation3], 4294967168  ;;  %v21_v0 = vld [vmem:[#allocation2] sm:$0xff]  ;;  %s88_s11 = smov 1   ;;  %s89_s12 = smov [#allocation5]  }
   0xe   :  { %22 = vrot.lane.b32.xlu0 %v21_v0, %s88_s11  ;;  %s31_s13 = sshll.u32 %s89_s12, 4  ;;  %s32_s13 = int_to_ptr.vmem [resolvable:$true] %s31_s13 }
   0xf   :  { %s63_s14 = scalar_lea.vmem %s32_s13, 128  ;;  %p68_p6 = scmp.lt.s32.totalorder %s32_s13, %s32_s13 }
  0x10   :  { %p64_p5 = scmp.ne.s32.totalorder %s32_s13, %s63_s14  ;;  %p69_p7 = scmp.lt.s32.totalorder %s63_s14, %s63_s14 }
  0x12   :  { %p70_p8 = por %p69_p7, %p68_p6 }
  0x14   :  { %p71_p9 = pnand %p70_p8, %p64_p5 }
  0x80   :  { %v23_v1 = vpop.permute.xlu0 %22 }
  0x81   :  { %24 = vst [vmem:[#allocation5] sm:$0xff] %v23_v1 }
  0x82   :  { %74 = shalt.err (!%p71_p9)
}
  0x83   :  { %34 = dma.vmem_to_hbm [thread:$0]  %s32_s13, 128, %s107_s1, [#allocation4]  }
  0x84   :  { %85 = dma.done.wait [#allocation4], 128  }
  0x85   :  { %86 = vsyncadd [#allocation4], 4294967168 }
  0x86   :  { %38 = vsyncpa [#allocation3], 1 }
  0x87   :  { %39 = vsyncpa [#allocation4], 1 }

</bundles_post_ra>
